<compile_context>
chip_gen: v7x
topology: tpu7x:2x2x1
jax: 0.10.0
libtpu: 0.0.40
codegen_flags: <defaults>
</compile_context>

<pallas_src>
import functools

import jax
import jax.numpy as jnp
from jax import lax
from jax.experimental import pallas as pl
from jax.experimental.pallas import tpu as pltpu


# ---------------------------------------------------------------------------
# Pallas kernels
# ---------------------------------------------------------------------------

def _linear_kernel(x_ref, w_ref, b_ref, o_ref):
    # y = x @ W.T + b   (PyTorch nn.Linear convention, W: (out, in))
    y = lax.dot_general(x_ref[...], w_ref[...], (((1,), (1,)), ((), ())),
                        preferred_element_type=jnp.float32)
    o_ref[...] = y + b_ref[...]


def linear(x, w, b):
    n = x.shape[0]
    out_dim = w.shape[0]
    return pl.pallas_call(
        _linear_kernel,
        out_shape=jax.ShapeDtypeStruct((n, out_dim), jnp.float32),
        in_specs=[pl.BlockSpec(memory_space=pltpu.MemorySpace.VMEM)] * 3,
        out_specs=pl.BlockSpec(memory_space=pltpu.MemorySpace.VMEM),
    )(x.astype(jnp.float32), w, b.reshape(1, out_dim))


def _relation_kernel(x_ref, s_ref, t_ref, ew_ref,
                     wlr_ref, blr_ref, wself_ref, bself_ref,
                     wsrc_ref, wtgt_ref, wsa_ref, batt_ref,
                     o_ref, *, num_heads, fdim):
    """Entire ResGATHetLayer (all heads) for one relation.

    x_ref    : (N, OF)      shared node features (resident across grid)
    s_ref    : (E, N)       one-hot rows for edge_index[0] (source)
    t_ref    : (E, N)       one-hot rows for edge_index[1] (target)
    ew_ref   : (E, 1)       edge weights
    wlr_ref  : (2*OF, OF)   stacked [w_lin ; w_res]
    blr_ref  : (1, 2*OF)    stacked [b_lin , b_res]
    wself_ref: (OF, OF)     kron(I_H, w_self)   (block-diag self_attention_lin)
    bself_ref: (1, OF)      tile(b_self, H)
    wsrc_ref : (OF, H)      kron(I_H, w_att[:, :F].T)      -> source term
    wtgt_ref : (OF, H)      kron(I_H, w_att[:, F:2F].T)    -> target term
    wsa_ref  : (OF, H)      kron(I_H, w_att[:, 2F:].T)     -> alpha_self term
    batt_ref : (1, 1)       att_lin bias
    o_ref    : (N, OF)      layer output for this relation
    """
    mm = functools.partial(lax.dot_general, preferred_element_type=jnp.float32)

    x = x_ref[...]            # (N, OF)
    S = s_ref[...]            # (E, N)
    T = t_ref[...]            # (E, N)
    ew = ew_ref[...]          # (E, 1)
    of = x.shape[1]

    # Fused lin + residual_lin projections (dropout p=0.5 -> identity, eval).
    z = mm(x, wlr_ref[...], (((1,), (1,)), ((), ()))) + blr_ref[...]   # (N, 2*OF)
    h = z[:, :of]             # lin(x), heads laid out as column blocks of F
    res = z[:, of:]           # residual_lin(x)

    # self_attention_lin applied per head via block-diagonal weight.
    h_self = mm(h, wself_ref[...], (((1,), (1,)), ((), ()))) + bself_ref[...]  # (N, OF)

    # Factorized attention logits:
    #   logit[e,h] = <x_src,w1> + <x_tgt,w2> + <a_self,w3> + b
    #             = (S @ p_src)[e,h] + (T @ p_tgt)[e,h] + b
    p_src = (mm(h, wsrc_ref[...], (((1,), (0,)), ((), ())))
             + mm(h_self, wsa_ref[...], (((1,), (0,)), ((), ()))))     # (N, H)
    p_tgt = mm(h, wtgt_ref[...], (((1,), (0,)), ((), ())))             # (N, H)

    logit = (mm(S, p_src, (((1,), (0,)), ((), ())))
             + mm(T, p_tgt, (((1,), (0,)), ((), ())))
             + batt_ref[...])                                          # (E, H)
    logit = jnp.where(logit >= 0, logit, 0.2 * logit)                  # leaky_relu(0.2)

    # scatter_softmax grouped by source node (edge_index[0]).
    big = jnp.float32(1e30)
    neg_mask = (S - 1.0) * big                   # (E, N): 0 on edges, -1e30 elsewhere
    gmax_rows = []
    for hd in range(num_heads):
        masked = S * logit[:, hd:hd + 1] + neg_mask          # (E, N)
        gmax_rows.append(jnp.max(masked, axis=0, keepdims=True))   # (1, N)
    gmax = jnp.concatenate(gmax_rows, axis=0)                # (H, N) per-source max

    max_e = mm(S, gmax, (((1,), (1,)), ((), ())))            # (E, H) gather back to edges
    ex = jnp.exp(logit - max_e)                              # (E, H)
    denom = mm(S, ex, (((0,), (0,)), ((), ())))              # (N, H) per-source sums
    denom_e = mm(S, denom, (((1,), (0,)), ((), ())))         # (E, H)
    # denom_e >= 1 for every real edge (max element contributes exp(0)); the
    # floor only protects zero-padded edges from producing inf/NaN.
    alpha = ex / jnp.maximum(denom_e, jnp.float32(1e-20))    # (E, H)

    # message = edge_weight * alpha * x_src ; aggr='add' at target ; +residual.
    w_edge = ew * alpha                                      # (E, H)
    # Expand per-head weight across that head's F lanes via a constant matmul.
    row_head = lax.broadcasted_iota(jnp.int32, (num_heads, num_heads * fdim), 0)
    col_head = lax.broadcasted_iota(jnp.int32, (num_heads, num_heads * fdim), 1) // fdim
    expand = (row_head == col_head).astype(jnp.float32)      # (H, OF)
    w_full = mm(w_edge, expand, (((1,), (0,)), ((), ())))    # (E, OF)

    x_src = mm(S, h, (((1,), (0,)), ((), ())))               # (E, OF) gather all heads
    msg = w_full * x_src                                     # (E, OF)
    agg = mm(T, msg, (((0,), (0,)), ((), ())))               # (N, OF) scatter-add @ target
    o_ref[...] = agg + res


# ---------------------------------------------------------------------------
# Model wrappers (plain-JAX glue around the Pallas kernels)
# ---------------------------------------------------------------------------

def res_gat_relations(x, edge_data, att_params, num_heads):
    """Run all ResGATHetLayer relations in ONE gridded pallas_call."""
    N, OF = x.shape
    F = OF // num_heads
    R = len(edge_data)
    E = max(int(ei.shape[1]) for ei, _ in edge_data)

    # Build dense incidence matrices (one-hot) per relation; pad ragged edge
    # counts with inert all-zero rows / zero weights (do not touch any softmax
    # group or any aggregation target).
    S_list, T_list, ew_list = [], [], []
    for edge_index, edge_weight in edge_data:
        e = int(edge_index.shape[1])
        s = jax.nn.one_hot(edge_index[0], N, dtype=jnp.float32)
        t = jax.nn.one_hot(edge_index[1], N, dtype=jnp.float32)
        w = edge_weight.reshape(e, 1).astype(jnp.float32)
        if e < E:
            pad = E - e
            s = jnp.concatenate([s, jnp.zeros((pad, N), jnp.float32)], axis=0)
            t = jnp.concatenate([t, jnp.zeros((pad, N), jnp.float32)], axis=0)
            w = jnp.concatenate([w, jnp.zeros((pad, 1), jnp.float32)], axis=0)
        S_list.append(s)
        T_list.append(t)
        ew_list.append(w)
    S_all = jnp.stack(S_list)            # (R, E, N)
    T_all = jnp.stack(T_list)            # (R, E, N)
    ew_all = jnp.stack(ew_list)          # (R, E, 1)

    eye_h = jnp.eye(num_heads, dtype=jnp.float32)
    wlr, blr, wself, bself, wsrc, wtgt, wsa, batt = ([] for _ in range(8))
    for p in att_params:
        wlr.append(jnp.concatenate([p["w_lin"], p["w_res"]], axis=0))            # (2OF, OF)
        blr.append(jnp.concatenate([p["b_lin"], p["b_res"]], axis=0)[None, :])   # (1, 2OF)
        wself.append(jnp.kron(eye_h, p["w_self"]))                               # (OF, OF)
        bself.append(jnp.tile(p["b_self"], num_heads)[None, :])                  # (1, OF)
        w_att = p["w_att"].reshape(3 * F)
        wsrc.append(jnp.kron(eye_h, w_att[:F].reshape(F, 1)))                    # (OF, H)
        wtgt.append(jnp.kron(eye_h, w_att[F:2 * F].reshape(F, 1)))               # (OF, H)
        wsa.append(jnp.kron(eye_h, w_att[2 * F:].reshape(F, 1)))                 # (OF, H)
        batt.append(p["b_att"].reshape(1, 1))                                    # (1, 1)

    wlr_all, blr_all = jnp.stack(wlr), jnp.stack(blr)
    wself_all, bself_all = jnp.stack(wself), jnp.stack(bself)
    wsrc_all, wtgt_all, wsa_all = jnp.stack(wsrc), jnp.stack(wtgt), jnp.stack(wsa)
    batt_all = jnp.stack(batt)

    kernel = functools.partial(_relation_kernel, num_heads=num_heads, fdim=F)
    per_rel = lambda r: (r, 0, 0)
    out = pl.pallas_call(
        kernel,
        out_shape=jax.ShapeDtypeStruct((R, N, OF), jnp.float32),
        grid=(R,),
        in_specs=[
            pl.BlockSpec((N, OF), lambda r: (0, 0)),               # x (shared, resident)
            pl.BlockSpec((None, E, N), per_rel),                   # S
            pl.BlockSpec((None, E, N), per_rel),                   # T
            pl.BlockSpec((None, E, 1), per_rel),                   # edge weight
            pl.BlockSpec((None, 2 * OF, OF), per_rel),             # [w_lin; w_res]
            pl.BlockSpec((None, 1, 2 * OF), per_rel),              # [b_lin, b_res]
            pl.BlockSpec((None, OF, OF), per_rel),                 # block-diag w_self
            pl.BlockSpec((None, 1, OF), per_rel),                  # tiled b_self
            pl.BlockSpec((None, OF, num_heads), per_rel),          # w_att src part
            pl.BlockSpec((None, OF, num_heads), per_rel),          # w_att tgt part
            pl.BlockSpec((None, OF, num_heads), per_rel),          # w_att self part
            pl.BlockSpec((None, 1, 1), per_rel),                   # b_att
        ],
        out_specs=pl.BlockSpec((None, N, OF), per_rel),
        compiler_params=pltpu.CompilerParams(
            dimension_semantics=("parallel",)),                    # shard relations on v7x
    )(x, S_all, T_all, ew_all, wlr_all, blr_all, wself_all, bself_all,
      wsrc_all, wtgt_all, wsa_all, batt_all)
    return out   # (R, N, OF)


def res_gat_het_forward(params, node_feats, edge_data, num_heads, out_features):
    node_types = list(node_feats.keys())

    # Per-node-type embedding then concat along nodes.
    xs = [linear(node_feats[nt], params["emb"][nt]["w"], params["emb"][nt]["b"])
          for nt in node_types]
    x = jnp.concatenate(xs, axis=0)                      # (N_total, out_features)

    out_all = res_gat_relations(x, edge_data, params["att"], num_heads)  # (R, N, OF)

    # dropout(p=0.2) -> identity (eval mode).
    # The reference computes final_transform(x_combined) but immediately
    # overwrites the result with the stack below -> dead code, dropped.
    # torch.stack(x_list, dim=1).view(-1, out_features): (N, R, OF) -> (N*R, OF)
    x_out = jnp.transpose(out_all, (1, 0, 2)).reshape(-1, out_features)

    node_type_ranges = {}
    start = 0
    for nt in node_types:
        n = node_feats[nt].shape[0]
        node_type_ranges[nt] = (start, start + n)
        start += n
    return x_out, node_type_ranges


# ---------------------------------------------------------------------------
# Deterministic parameter init (PyTorch nn.Linear shapes: W (out, in), b (out,))
# ---------------------------------------------------------------------------

def init_linear(key, out_dim, in_dim):
    kw, kb = jax.random.split(key)
    w = 0.1 * jax.random.normal(kw, (out_dim, in_dim), jnp.float32)
    b = 0.1 * jax.random.normal(kb, (out_dim,), jnp.float32)
    return w, b


def init_params(key, in_features_dict, out_features, num_edge_types, num_heads):
    F = out_features // num_heads
    params = {"emb": {}, "att": []}
    for nt, in_feat in in_features_dict.items():
        key, sub = jax.random.split(key)
        w, b = init_linear(sub, out_features, in_feat)
        params["emb"][nt] = {"w": w, "b": b}
    for _ in range(num_edge_types):
        key, k1, k2, k3, k4 = jax.random.split(key, 5)
        w_self, b_self = init_linear(k1, F, F)
        w_lin, b_lin = init_linear(k2, out_features, out_features)
        w_att, b_att = init_linear(k3, 1, 3 * F)
        w_res, b_res = init_linear(k4, out_features, out_features)
        params["att"].append({
            "w_self": w_self, "b_self": b_self,
            "w_lin": w_lin, "b_lin": b_lin,
            "w_att": w_att, "b_att": b_att,
            "w_res": w_res, "b_res": b_res,
        })
    # final_transform params kept for module parity (unused: reference discards it).
    key, sub = jax.random.split(key)
    w_final, b_final = init_linear(sub, out_features,
                                   num_edge_types * out_features)
    params["w_final"] = w_final
    params["b_final"] = b_final
    return params


# ---------------------------------------------------------------------------

if __name__ == "__main__":
    key = jax.random.PRNGKey(0)

    in_features_dict = {"user": 12, "item": 10}
    num_nodes = {"user": 8, "item": 8}
    out_features = 32
    num_heads = 4
    num_edge_types = 2
    E = 24
    N_total = sum(num_nodes.values())

    key, kp = jax.random.split(key)
    params = init_params(kp, in_features_dict, out_features, num_edge_types,
                         num_heads)

    # Synthetic heterogeneous graph data.
    node_feats = {}
    for nt, in_feat in in_features_dict.items():
        key, sub = jax.random.split(key)
        node_feats[nt] = jax.random.normal(sub, (num_nodes[nt], in_feat),
                                           jnp.float32)

    edge_data = []
    for _ in range(num_edge_types):
        key, ki, kw = jax.random.split(key, 3)
        edge_index = jax.random.randint(ki, (2, E), 0, N_total, dtype=jnp.int32)
        edge_weight = jax.random.uniform(kw, (E,), jnp.float32, 0.5, 1.5)
        edge_data.append((edge_index, edge_weight))

    x_out, node_type_ranges = res_gat_het_forward(
        params, node_feats, edge_data, num_heads, out_features)

    x_out = jax.block_until_ready(x_out)
    assert x_out.shape == (N_total * num_edge_types, out_features)
    assert bool(jnp.all(jnp.isfinite(x_out)))
    # TODO(synk): torch_geometric HeteroData container handling is replaced by
    # plain dicts of node features / (edge_index, edge_weight) tuples.
    print("KERNEL_OK")
</pallas_src>

<mosaic_0001>
module attributes {stable_mosaic.version = 11 : i64} {
  func.func @_linear_kernel(%arg0: memref<8x12xf32, #tpu.memory_space<vmem>>, %arg1: memref<32x12xf32, #tpu.memory_space<vmem>>, %arg2: memref<1x32xf32, #tpu.memory_space<vmem>>, %arg3: memref<8x32xf32, #tpu.memory_space<vmem>>) attributes {dimension_semantics = [], scalar_prefetch = 0 : i64, scratch_operands = 0 : i64, tpu.core_type = #tpu.core_type<tc>} {
    %c0 = arith.constant 0 : index
    %c0_0 = arith.constant 0 : index
    %0 = vector.load %arg0[%c0, %c0_0] : memref<8x12xf32, #tpu.memory_space<vmem>>, vector<8x12xf32>
    %c0_1 = arith.constant 0 : index
    %c0_2 = arith.constant 0 : index
    %1 = vector.load %arg1[%c0_1, %c0_2] : memref<32x12xf32, #tpu.memory_space<vmem>>, vector<32x12xf32>
    %cst = arith.constant dense<0.000000e+00> : vector<8x32xf32>
    %2 = tpu.matmul %0, %1, %cst {dimension_numbers = #tpu.dot_dimension_numbers<[1], [1], [0], [0], [0, 0, 1, 0], [], []>} : vector<8x12xf32>, vector<32x12xf32>, vector<8x32xf32> -> vector<8x32xf32>
    %c0_3 = arith.constant 0 : index
    %c0_4 = arith.constant 0 : index
    %3 = vector.load %arg2[%c0_3, %c0_4] : memref<1x32xf32, #tpu.memory_space<vmem>>, vector<1x32xf32>
    %4 = vector.broadcast %3 : vector<1x32xf32> to vector<8x32xf32>
    %5 = arith.addf %2, %4 : vector<8x32xf32>
    %c0_5 = arith.constant 0 : index
    %c0_6 = arith.constant 0 : index
    %6 = vector.load %arg3[%c0_5, %c0_6] : memref<8x32xf32, #tpu.memory_space<vmem>>, vector<8x32xf32>
    tpu.vector_store %arg3[%c0_5, %c0_6], %5 {strides = array<i32>} : memref<8x32xf32, #tpu.memory_space<vmem>>, vector<8x32xf32>,
    return
  }
}

</mosaic_0001>

<bundles_post_ra>
// kernel: tpu_custom_call.1
= control target key start
LH: loop header
LB: loop body
LE: loop exit
PB: predicated region body
PF: predicated region fallthrough
CT: control target
= control target key end

     0   :  { %vm27_vm0 = vcmask 97280   ;;  %v187_v2 = vmov 0.0|0.0   ;;  %vm188_vm2 = vmmov 0   ;;  %v189_v4 = vmov 0.0   ;;  %s244_s0 = inlined_call_operand.vmem [shape: f32[8,12], index: 0, kind: input, shape index: {}]   ;;  %s245_s1 = inlined_call_operand.vmem [shape: f32[32,12], index: 1, kind: input, shape index: {}]   ;;  %s246_s2 = inlined_call_operand.vmem [shape: f32[1,32], index: 2, kind: input, shape index: {}]   ;;  %s247_s3 = inlined_call_operand.hbm [shape: f32[8,32], index: 3, kind: output, shape index: {}]  }
   0x1   :  { %v16_v0 = vld [vmem:[%s245_s1] sm:$0xff]  ;;  %v17_v1 = vld [vmem:[%s245_s1 + $0x8] sm:$0xff]  ;;  %151 = vmatprep.subr.bf16.mxu0 %v187_v2  ;;  %vm153_vm1 = vmpackc.low %vm27_vm0, %vm27_vm0  ;;  %148 = vmatprep.mubr.msk.f32.mxu0 %vm188_vm2, %v189_v4 }
   0x2   :  { %v152_v3 = vpack.c.bf16 %v17_v1, %v16_v0 }
   0x3   :  { %8 = vsyncpa [#allocation3], 0  ;;  %v18_v5 = vld [vmem:[%s245_s1 + $0x10] sm:$0xff]  ;;  %v19_v6 = vld [vmem:[%s245_s1 + $0x18] sm:$0xff]  ;;  %s190_s24 = smov [#allocation2]   ;;  %vm113_vm3 = vcmask 261120  }
   0x4   :  { %154 = vmatpush3.bf16.xpose.msk.msra.mxu0 %vm153_vm1, %v152_v3  ;;  %v156_v7 = vpack.c.bf16 %v19_v6, %v18_v5  ;;  %v15_v8 = vld [vmem:[%s244_s0] sm:$0xff]  ;;  %s121_s25 = sshll.u32 %s190_s24, 4  ;;  %s122_s25 = int_to_ptr.vmem [resolvable:$true] %s121_s25 }
   0x5   :  { %155 = vmatprep.subr.bf16.mxu0 %v187_v2  ;;  %v129_v9 = vld [vmem:[%s246_s2] ss:$0 sm:$0xff]  ;;  %s163_s1 = scalar_lea.vmem %s122_s25, 128  ;;  %p168_p1 = scmp.lt.s32.totalorder %s122_s25, %s122_s25 }
   0x6   :  { %p164_p0 = scmp.ne.s32.totalorder %s122_s25, %s163_s1  ;;  %p169_p2 = scmp.lt.s32.totalorder %s163_s1, %s163_s1 }
   0x8   :  { %p170_p3 = por %p169_p2, %p168_p1 }
   0xa   :  { %p171_p4 = pnand %p170_p3, %p164_p0 }
   0xc   :  { %158 = vmatpush3.bf16.xpose.msk.msra.mxu0 %vm153_vm1, %v156_v7 }
  0x13   :  { %149 = vmatmul.mubr.msk.f32.vlgmr.msra.gmra.mrb[0].mxu0 %vm27_vm0, %v15_v8 }
  0xe6   :  { %v109_v10 = vpop.f32.mrb[0].mxu0 }
  0xe7   :  { %v110_v11 = vadd.f32 %v129_v9, %v109_v10  ;;  %v150_v12 = vpop.f32.mrb[1].mxu0 }
  0xe9   :  { %114 = vst.msk [vmem:[#allocation2] sm:$0xff] %vm113_vm3, %v110_v11 }
  0xea   :  { %174 = shalt.err (!%p171_p4)
}
  0xeb   :  { %s175_s27 = scalar_lea.hbm %s247_s3, 128 }
  0xec   :  { %p176_p5 = scmp.ne.s32.totalorder %s247_s3, %s175_s27  ;;  %p179_p6 = scmp.lt.u32.totalorder %s175_s27, %s247_s3 }
  0xee   :  { %p181_p7 = pnand %p179_p6, %p176_p5 }
  0xf0   :  { %184 = shalt.err (!%p181_p7)
}
  0xf1   :  { %124 = dma.vmem_to_hbm [thread:$0]  %s122_s25, 128, %s247_s3, [#allocation3]  }
  0xf2   :  { %185 = dma.done.wait [#allocation3], 128  }
  0xf3   :  { %186 = vsyncadd [#allocation3], 4294967168 }
  0xf4   :  { %128 = vsyncpa [#allocation3], 1 }

</bundles_post_ra>
